<compile_context>
chip_gen: v7x
topology: tpu7x:2x2x1
jax: 0.10.0
libtpu: 0.0.40
codegen_flags: <defaults>
</compile_context>

<pallas_src>
import jax
import jax.numpy as jnp
import numpy as np
from jax.experimental import pallas as pl
from jax.experimental.pallas import tpu as pltpu

EPS = 1e-5
R0 = 8  # sublane-aligned row offset of the intermediate's interior inside the scratch


def conv_block_kernel(xp_ref, w1_ref, w2_ref, gb_ref, red_ref, bc_ref, o_ref, y1p_ref):
    N, Hp2, _ = xp_ref.shape
    H = Hp2 - 2
    WCout = o_ref.shape[-1]

    red = red_ref[...]   # (W*Cout, Cout) channel-reduce matrix, pre-scaled by 1/(N*H*W)
    bc = bc_ref[...]     # (Cout, W*Cout) lane-broadcast matrix
    gb = gb_ref[...]     # (4, Cout): rows = g1, b1, g2, b2

    def fused_lhs(t0, t1, t2):
        # Three (N, H, K) row taps -> im2col'ed (N*H, 3K) LHS: one MXU push per conv.
        K = t0.shape[-1]
        return jnp.concatenate([t0, t1, t2], axis=-1).reshape(N * H, 3 * K)

    def bn_relu(y, g, b):
        # Single-pass training-mode BatchNorm over (N, H, W) + ReLU, lane-packed layout.
        stats = jnp.concatenate(
            [jnp.sum(y, axis=0, keepdims=True),
             jnp.sum(y * y, axis=0, keepdims=True)], axis=0)              # (2, W*Cout)
        ch = jnp.dot(stats, red, preferred_element_type=jnp.float32)      # (2, Cout): mean, E[y^2]
        mean = ch[0:1]
        var = ch[1:2] - mean * mean                                       # biased variance
        a = g * jax.lax.rsqrt(var + EPS)                                  # EUP rsqrt
        ab = jnp.concatenate([a, b - mean * a], axis=0)                   # (2, Cout)
        abl = jnp.dot(ab, bc, preferred_element_type=jnp.float32)         # (2, W*Cout) lane-tiled
        return jnp.maximum(y * abl[0:1] + abl[1:2], 0.0)                  # one VALU sweep

    # ---- conv1 (single fused-K MXU matmul) -> BN -> ReLU --------------------------------
    xp = xp_ref[...].astype(jnp.float32)                                  # (N, H+2, W*Cin)
    lhs1 = fused_lhs(xp[:, 0:H], xp[:, 1:H + 1], xp[:, 2:H + 2])          # (N*H, 3*W*Cin)
    y1 = bn_relu(jnp.dot(lhs1, w1_ref[...], preferred_element_type=jnp.float32),
                 gb[0:1], gb[1:2])

    # ---- row-pad the intermediate in a sublane-aligned scratch --------------------------
    # Interior lives at rows [R0, R0+H) (aligned -> unmasked store); only the two border
    # rows are zeroed.
    zero_row = jnp.zeros((N, 1, WCout), jnp.float32)
    y1p_ref[:, R0 - 1:R0, :] = zero_row
    y1p_ref[:, R0 + H:R0 + H + 1, :] = zero_row
    y1p_ref[:, R0:R0 + H, :] = y1.reshape(N, H, WCout)

    # ---- conv2 (single fused-K MXU matmul) -> BN -> ReLU --------------------------------
    lhs2 = fused_lhs(y1p_ref[:, R0 - 1:R0 - 1 + H, :],
                     y1p_ref[:, R0:R0 + H, :],
                     y1p_ref[:, R0 + 1:R0 + 1 + H, :])                    # (N*H, 3*W*Cout)
    y2 = bn_relu(jnp.dot(lhs2, w2_ref[...], preferred_element_type=jnp.float32),
                 gb[2:3], gb[3:4])
    o_ref[...] = y2.reshape(N, H, WCout).astype(o_ref.dtype)


def _band_weights_fused(w, Wdim):
    """w: (Cout, Cin, 3, 3) -> (3*Wdim*Cin, Wdim*Cout) fused banded weight matrix.

    For each ky the banded block maps lane wi*Cin+ci -> lane wo*Cout+co with weight
    w[co, ci, ky, kx] where wi = wo + kx - 1 (kx taps and width-wise zero padding folded
    into the band); the three ky blocks are stacked along K so the whole 3x3 conv is a
    single matmul against the im2col'ed row taps.
    """
    w = w.astype(jnp.float32)
    mats = []
    for ky in range(3):
        m = sum(jnp.kron(jnp.eye(Wdim, k=1 - kx, dtype=jnp.float32), w[:, :, ky, kx].T)
                for kx in range(3))
        mats.append(m)
    return jnp.concatenate(mats, axis=0)


def conv_block_forward(x_nchw, w1, g1, b1, w2, g2, b2):
    """x_nchw: (N, Cin, H, W); w*: PyTorch (Cout, Cin, 3, 3); g*/b*: (Cout,)."""
    N, Cin, H, W = x_nchw.shape
    Cout = w1.shape[0]
    WCin, WCout = W * Cin, W * Cout
    # NOTE: layout assumes W*Cout is a multiple of 128 for lane-dense stores; other shapes
    # remain correct but fall back to masked lane ops.

    # Lane-packed NHWC -> (N, H, W*Cin); pad rows only (lane dim needs no padding).
    xpk = jnp.transpose(x_nchw, (0, 2, 3, 1)).reshape(N, H, WCin)
    xp = jnp.pad(xpk, ((0, 0), (1, 1), (0, 0))).astype(jnp.float32)

    w1f = _band_weights_fused(w1, W)   # (3*W*Cin,  W*Cout)
    w2f = _band_weights_fused(w2, W)   # (3*W*Cout, W*Cout)

    gb = jnp.stack([g1, b1, g2, b2]).astype(jnp.float32)               # (4, Cout)

    lane = jnp.arange(WCout)
    ch = jnp.arange(Cout)
    red = ((lane[:, None] % Cout) == ch[None, :]).astype(jnp.float32) / (N * H * W)  # (W*Cout, Cout)
    bcast = ((lane[None, :] % Cout) == ch[:, None]).astype(jnp.float32)              # (Cout, W*Cout)

    Hs = ((R0 + H + 1 + 7) // 8) * 8   # aligned scratch rows for the padded intermediate

    cost = pl.CostEstimate(
        flops=2 * N * H * (3 * WCin * WCout + 3 * WCout * WCout)
              + 2 * 2 * (2 * WCout * Cout + 2 * Cout * WCout),
        transcendentals=2 * Cout,
        bytes_accessed=4 * (xp.size + w1f.size + w2f.size + gb.size
                            + red.size + bcast.size + N * H * WCout),
    )

    out = pl.pallas_call(
        conv_block_kernel,
        out_shape=jax.ShapeDtypeStruct((N, H, WCout), jnp.float32),
        in_specs=[pl.BlockSpec(memory_space=pltpu.MemorySpace.VMEM)] * 6,
        out_specs=pl.BlockSpec(memory_space=pltpu.MemorySpace.VMEM),
        scratch_shapes=[pltpu.VMEM((N, Hs, WCout), jnp.float32)],
        compiler_params=pltpu.CompilerParams(vmem_limit_bytes=32 * 1024 * 1024),
        cost_estimate=cost,
    )(xp, w1f, w2f, gb, red, bcast)

    # (N, H, W*Cout) -> NCHW
    return jnp.transpose(out.reshape(N, H, W, Cout), (0, 3, 1, 2)).astype(x_nchw.dtype)


def conv_block_reference(x, w1, g1, b1, w2, g2, b2):
    """Pure-JAX reference (NCHW), mirrors PyTorch training-mode forward."""
    def conv(x, w):
        return jax.lax.conv_general_dilated(
            x, w, window_strides=(1, 1), padding=((1, 1), (1, 1)),
            dimension_numbers=('NCHW', 'OIHW', 'NCHW'))

    def bn_relu(y, g, b):
        mean = jnp.mean(y, axis=(0, 2, 3), keepdims=True)
        var = jnp.mean((y - mean) ** 2, axis=(0, 2, 3), keepdims=True)
        yhat = (y - mean) / jnp.sqrt(var + EPS)
        return jnp.maximum(yhat * g.reshape(1, -1, 1, 1) + b.reshape(1, -1, 1, 1), 0.0)

    y = bn_relu(conv(x, w1), g1, b1)
    return bn_relu(conv(y, w2), g2, b2)


if __name__ == "__main__":
    key = jax.random.PRNGKey(0)
    N, Cin, Cout, H, W = 2, 4, 8, 16, 16

    k_x, k_w1, k_w2 = jax.random.split(key, 3)
    x = jax.random.normal(k_x, (N, Cin, H, W), dtype=jnp.float32)

    # Deterministic parameter init (Kaiming-style scale for convs; PyTorch BN defaults)
    w1 = jax.random.normal(k_w1, (Cout, Cin, 3, 3), jnp.float32) * np.sqrt(2.0 / (Cin * 9))
    w2 = jax.random.normal(k_w2, (Cout, Cout, 3, 3), jnp.float32) * np.sqrt(2.0 / (Cout * 9))
    g1 = jnp.ones((Cout,), jnp.float32)
    b1 = jnp.zeros((Cout,), jnp.float32)
    g2 = jnp.ones((Cout,), jnp.float32)
    b2 = jnp.zeros((Cout,), jnp.float32)

    out = conv_block_forward(x, w1, g1, b1, w2, g2, b2)
    out = jax.block_until_ready(out)

    ref = jax.block_until_ready(conv_block_reference(x, w1, g1, b1, w2, g2, b2))
    assert out.shape == (N, Cout, H, W), out.shape
    np.testing.assert_allclose(np.asarray(out), np.asarray(ref), rtol=2e-3, atol=2e-3)

    print("KERNEL_OK")
</pallas_src>

<mosaic_0001>
module attributes {stable_mosaic.version = 11 : i64} {
  func.func @conv_block_kernel(%arg0: memref<2x18x64xf32, #tpu.memory_space<vmem>>, %arg1: memref<192x128xf32, #tpu.memory_space<vmem>>, %arg2: memref<384x128xf32, #tpu.memory_space<vmem>>, %arg3: memref<4x8xf32, #tpu.memory_space<vmem>>, %arg4: memref<128x8xf32, #tpu.memory_space<vmem>>, %arg5: memref<8x128xf32, #tpu.memory_space<vmem>>, %arg6: memref<2x16x128xf32, #tpu.memory_space<vmem>>, %arg7: memref<2x32x128xf32, #tpu.memory_space<vmem>>) attributes {dimension_semantics = [], scalar_prefetch = 0 : i64, scratch_operands = 1 : i64, tpu.core_type = #tpu.core_type<tc>} {
    %c0 = arith.constant 0 : index
    %c0_0 = arith.constant 0 : index
    %0 = vector.load %arg4[%c0, %c0_0] : memref<128x8xf32, #tpu.memory_space<vmem>>, vector<128x8xf32>
    %c0_1 = arith.constant 0 : index
    %c0_2 = arith.constant 0 : index
    %1 = vector.load %arg5[%c0_1, %c0_2] : memref<8x128xf32, #tpu.memory_space<vmem>>, vector<8x128xf32>
    %c0_3 = arith.constant 0 : index
    %c0_4 = arith.constant 0 : index
    %2 = vector.load %arg3[%c0_3, %c0_4] : memref<4x8xf32, #tpu.memory_space<vmem>>, vector<4x8xf32>
    %c0_5 = arith.constant 0 : index
    %c0_6 = arith.constant 0 : index
    %c0_7 = arith.constant 0 : index
    %3 = vector.load %arg0[%c0_5, %c0_6, %c0_7] : memref<2x18x64xf32, #tpu.memory_space<vmem>>, vector<2x18x64xf32>
    %4 = vector.extract_strided_slice %3 {offsets = [0, 0, 0], sizes = [2, 16, 64], strides = [1, 1, 1]} : vector<2x18x64xf32> to vector<2x16x64xf32>
    %5 = vector.extract_strided_slice %3 {offsets = [0, 1, 0], sizes = [2, 16, 64], strides = [1, 1, 1]} : vector<2x18x64xf32> to vector<2x16x64xf32>
    %6 = vector.extract_strided_slice %3 {offsets = [0, 2, 0], sizes = [2, 16, 64], strides = [1, 1, 1]} : vector<2x18x64xf32> to vector<2x16x64xf32>
    %7 = tpu.concatenate %4, %5, %6 in 2 : vector<2x16x64xf32>, vector<2x16x64xf32>, vector<2x16x64xf32> -> vector<2x16x192xf32>
    %8 = vector.shape_cast %7 : vector<2x16x192xf32> to vector<32x192xf32>
    %c0_8 = arith.constant 0 : index
    %c0_9 = arith.constant 0 : index
    %9 = vector.load %arg1[%c0_8, %c0_9] : memref<192x128xf32, #tpu.memory_space<vmem>>, vector<192x128xf32>
    %cst = arith.constant dense<0.000000e+00> : vector<32x128xf32>
    %10 = tpu.matmul %8, %9, %cst {dimension_numbers = #tpu.dot_dimension_numbers<[1], [0], [0], [1], [0, 0, 1, 1], [], []>} : vector<32x192xf32>, vector<192x128xf32>, vector<32x128xf32> -> vector<32x128xf32>
    %11 = vector.extract_strided_slice %2 {offsets = [0, 0], sizes = [1, 8], strides = [1, 1]} : vector<4x8xf32> to vector<1x8xf32>
    %12 = vector.extract_strided_slice %2 {offsets = [1, 0], sizes = [1, 8], strides = [1, 1]} : vector<4x8xf32> to vector<1x8xf32>
    %cst_10 = arith.constant dense<0.000000e+00> : vector<128xf32>
    %13 = vector.multi_reduction <add>, %10, %cst_10 [0] : vector<32x128xf32> to vector<128xf32>
    %14 = vector.shape_cast %13 : vector<128xf32> to vector<1x128xf32>
    %15 = arith.mulf %10, %10 : vector<32x128xf32>
    %cst_11 = arith.constant dense<0.000000e+00> : vector<128xf32>
    %16 = vector.multi_reduction <add>, %15, %cst_11 [0] : vector<32x128xf32> to vector<128xf32>
    %17 = vector.shape_cast %16 : vector<128xf32> to vector<1x128xf32>
    %18 = tpu.concatenate %14, %17 in 0 : vector<1x128xf32>, vector<1x128xf32> -> vector<2x128xf32>
    %cst_12 = arith.constant dense<0.000000e+00> : vector<2x8xf32>
    %19 = tpu.matmul %18, %0, %cst_12 {dimension_numbers = #tpu.dot_dimension_numbers<[1], [0], [0], [1], [0, 0, 1, 1], [], []>} : vector<2x128xf32>, vector<128x8xf32>, vector<2x8xf32> -> vector<2x8xf32>
    %20 = vector.extract_strided_slice %19 {offsets = [0, 0], sizes = [1, 8], strides = [1, 1]} : vector<2x8xf32> to vector<1x8xf32>
    %21 = vector.extract_strided_slice %19 {offsets = [1, 0], sizes = [1, 8], strides = [1, 1]} : vector<2x8xf32> to vector<1x8xf32>
    %22 = arith.mulf %20, %20 : vector<1x8xf32>
    %23 = arith.subf %21, %22 : vector<1x8xf32>
    %cst_13 = arith.constant 9.99999974E-6 : f32
    %24 = vector.broadcast %cst_13 : f32 to vector<1x8xf32>
    %25 = arith.addf %23, %24 : vector<1x8xf32>
    %26 = math.rsqrt %25 : vector<1x8xf32>
    %27 = arith.mulf %11, %26 : vector<1x8xf32>
    %28 = arith.mulf %20, %27 : vector<1x8xf32>
    %29 = arith.subf %12, %28 : vector<1x8xf32>
    %30 = tpu.concatenate %27, %29 in 0 : vector<1x8xf32>, vector<1x8xf32> -> vector<2x8xf32>
    %cst_14 = arith.constant dense<0.000000e+00> : vector<2x128xf32>
    %31 = tpu.matmul %30, %1, %cst_14 {dimension_numbers = #tpu.dot_dimension_numbers<[1], [0], [0], [1], [0, 0, 1, 1], [], []>} : vector<2x8xf32>, vector<8x128xf32>, vector<2x128xf32> -> vector<2x128xf32>
    %32 = vector.extract_strided_slice %31 {offsets = [0, 0], sizes = [1, 128], strides = [1, 1]} : vector<2x128xf32> to vector<1x128xf32>
    %33 = vector.broadcast %32 : vector<1x128xf32> to vector<32x128xf32>
    %34 = arith.mulf %10, %33 : vector<32x128xf32>
    %35 = vector.extract_strided_slice %31 {offsets = [1, 0], sizes = [1, 128], strides = [1, 1]} : vector<2x128xf32> to vector<1x128xf32>
    %36 = vector.broadcast %35 : vector<1x128xf32> to vector<32x128xf32>
    %37 = arith.addf %34, %36 : vector<32x128xf32>
    %cst_15 = arith.constant 0.000000e+00 : f32
    %38 = vector.broadcast %cst_15 : f32 to vector<32x128xf32>
    %39 = arith.maximumf %37, %38 : vector<32x128xf32>
    %cst_16 = arith.constant 0.000000e+00 : f32
    %40 = vector.broadcast %cst_16 : f32 to vector<2x1x128xf32>
    %c0_17 = arith.constant 0 : index
    %c7 = arith.constant 7 : index
    %c0_18 = arith.constant 0 : index
    %41 = vector.load %arg7[%c0_17, %c7, %c0_18] : memref<2x32x128xf32, #tpu.memory_space<vmem>>, vector<2x1x128xf32>
    tpu.vector_store %arg7[%c0_17, %c7, %c0_18], %40 {strides = array<i32>} : memref<2x32x128xf32, #tpu.memory_space<vmem>>, vector<2x1x128xf32>,
    %c0_19 = arith.constant 0 : index
    %c24 = arith.constant 24 : index
    %c0_20 = arith.constant 0 : index
    %42 = vector.load %arg7[%c0_19, %c24, %c0_20] : memref<2x32x128xf32, #tpu.memory_space<vmem>>, vector<2x1x128xf32>
    tpu.vector_store %arg7[%c0_19, %c24, %c0_20], %40 {strides = array<i32>} : memref<2x32x128xf32, #tpu.memory_space<vmem>>, vector<2x1x128xf32>,
    %43 = vector.shape_cast %39 : vector<32x128xf32> to vector<2x16x128xf32>
    %c0_21 = arith.constant 0 : index
    %c8 = arith.constant 8 : index
    %c0_22 = arith.constant 0 : index
    %44 = vector.load %arg7[%c0_21, %c8, %c0_22] : memref<2x32x128xf32, #tpu.memory_space<vmem>>, vector<2x16x128xf32>
    tpu.vector_store %arg7[%c0_21, %c8, %c0_22], %43 {strides = array<i32>} : memref<2x32x128xf32, #tpu.memory_space<vmem>>, vector<2x16x128xf32>,
    %c0_23 = arith.constant 0 : index
    %c7_24 = arith.constant 7 : index
    %c0_25 = arith.constant 0 : index
    %45 = vector.load %arg7[%c0_23, %c7_24, %c0_25] : memref<2x32x128xf32, #tpu.memory_space<vmem>>, vector<2x16x128xf32>
    %c0_26 = arith.constant 0 : index
    %c8_27 = arith.constant 8 : index
    %c0_28 = arith.constant 0 : index
    %46 = vector.load %arg7[%c0_26, %c8_27, %c0_28] : memref<2x32x128xf32, #tpu.memory_space<vmem>>, vector<2x16x128xf32>
    %c0_29 = arith.constant 0 : index
    %c9 = arith.constant 9 : index
    %c0_30 = arith.constant 0 : index
    %47 = vector.load %arg7[%c0_29, %c9, %c0_30] : memref<2x32x128xf32, #tpu.memory_space<vmem>>, vector<2x16x128xf32>
    %48 = tpu.concatenate %45, %46, %47 in 2 : vector<2x16x128xf32>, vector<2x16x128xf32>, vector<2x16x128xf32> -> vector<2x16x384xf32>
    %49 = vector.shape_cast %48 : vector<2x16x384xf32> to vector<32x384xf32>
    %c0_31 = arith.constant 0 : index
    %c0_32 = arith.constant 0 : index
    %50 = vector.load %arg2[%c0_31, %c0_32] : memref<384x128xf32, #tpu.memory_space<vmem>>, vector<384x128xf32>
    %cst_33 = arith.constant dense<0.000000e+00> : vector<32x128xf32>
    %51 = tpu.matmul %49, %50, %cst_33 {dimension_numbers = #tpu.dot_dimension_numbers<[1], [0], [0], [1], [0, 0, 1, 1], [], []>} : vector<32x384xf32>, vector<384x128xf32>, vector<32x128xf32> -> vector<32x128xf32>
    %52 = vector.extract_strided_slice %2 {offsets = [2, 0], sizes = [1, 8], strides = [1, 1]} : vector<4x8xf32> to vector<1x8xf32>
    %53 = vector.extract_strided_slice %2 {offsets = [3, 0], sizes = [1, 8], strides = [1, 1]} : vector<4x8xf32> to vector<1x8xf32>
    %cst_34 = arith.constant dense<0.000000e+00> : vector<128xf32>
    %54 = vector.multi_reduction <add>, %51, %cst_34 [0] : vector<32x128xf32> to vector<128xf32>
    %55 = vector.shape_cast %54 : vector<128xf32> to vector<1x128xf32>
    %56 = arith.mulf %51, %51 : vector<32x128xf32>
    %cst_35 = arith.constant dense<0.000000e+00> : vector<128xf32>
    %57 = vector.multi_reduction <add>, %56, %cst_35 [0] : vector<32x128xf32> to vector<128xf32>
    %58 = vector.shape_cast %57 : vector<128xf32> to vector<1x128xf32>
    %59 = tpu.concatenate %55, %58 in 0 : vector<1x128xf32>, vector<1x128xf32> -> vector<2x128xf32>
    %cst_36 = arith.constant dense<0.000000e+00> : vector<2x8xf32>
    %60 = tpu.matmul %59, %0, %cst_36 {dimension_numbers = #tpu.dot_dimension_numbers<[1], [0], [0], [1], [0, 0, 1, 1], [], []>} : vector<2x128xf32>, vector<128x8xf32>, vector<2x8xf32> -> vector<2x8xf32>
    %61 = vector.extract_strided_slice %60 {offsets = [0, 0], sizes = [1, 8], strides = [1, 1]} : vector<2x8xf32> to vector<1x8xf32>
    %62 = vector.extract_strided_slice %60 {offsets = [1, 0], sizes = [1, 8], strides = [1, 1]} : vector<2x8xf32> to vector<1x8xf32>
    %63 = arith.mulf %61, %61 : vector<1x8xf32>
    %64 = arith.subf %62, %63 : vector<1x8xf32>
    %cst_37 = arith.constant 9.99999974E-6 : f32
    %65 = vector.broadcast %cst_37 : f32 to vector<1x8xf32>
    %66 = arith.addf %64, %65 : vector<1x8xf32>
    %67 = math.rsqrt %66 : vector<1x8xf32>
    %68 = arith.mulf %52, %67 : vector<1x8xf32>
    %69 = arith.mulf %61, %68 : vector<1x8xf32>
    %70 = arith.subf %53, %69 : vector<1x8xf32>
    %71 = tpu.concatenate %68, %70 in 0 : vector<1x8xf32>, vector<1x8xf32> -> vector<2x8xf32>
    %cst_38 = arith.constant dense<0.000000e+00> : vector<2x128xf32>
    %72 = tpu.matmul %71, %1, %cst_38 {dimension_numbers = #tpu.dot_dimension_numbers<[1], [0], [0], [1], [0, 0, 1, 1], [], []>} : vector<2x8xf32>, vector<8x128xf32>, vector<2x128xf32> -> vector<2x128xf32>
    %73 = vector.extract_strided_slice %72 {offsets = [0, 0], sizes = [1, 128], strides = [1, 1]} : vector<2x128xf32> to vector<1x128xf32>
    %74 = vector.broadcast %73 : vector<1x128xf32> to vector<32x128xf32>
    %75 = arith.mulf %51, %74 : vector<32x128xf32>
    %76 = vector.extract_strided_slice %72 {offsets = [1, 0], sizes = [1, 128], strides = [1, 1]} : vector<2x128xf32> to vector<1x128xf32>
    %77 = vector.broadcast %76 : vector<1x128xf32> to vector<32x128xf32>
    %78 = arith.addf %75, %77 : vector<32x128xf32>
    %cst_39 = arith.constant 0.000000e+00 : f32
    %79 = vector.broadcast %cst_39 : f32 to vector<32x128xf32>
    %80 = arith.maximumf %78, %79 : vector<32x128xf32>
    %81 = vector.shape_cast %80 : vector<32x128xf32> to vector<2x16x128xf32>
    %c0_40 = arith.constant 0 : index
    %c0_41 = arith.constant 0 : index
    %c0_42 = arith.constant 0 : index
    %82 = vector.load %arg6[%c0_40, %c0_41, %c0_42] : memref<2x16x128xf32, #tpu.memory_space<vmem>>, vector<2x16x128xf32>
    tpu.vector_store %arg6[%c0_40, %c0_41, %c0_42], %81 {strides = array<i32>} : memref<2x16x128xf32, #tpu.memory_space<vmem>>, vector<2x16x128xf32>,
    return
  }
}

</mosaic_0001>

<bundles_post_ra>
// kernel: tpu_custom_call.1
= control target key start
LH: loop header
LB: loop body
LE: loop exit
PB: predicated region body
PF: predicated region fallthrough
CT: control target
= control target key end

     0   :  { %11 = vsyncpa [#allocation4], 0  ;;  %s1720_s0 = inlined_call_operand.vmem [shape: f32[2,18,64], index: 0, kind: input, shape index: {}]   ;;  %s1721_s1 = inlined_call_operand.vmem [shape: f32[192,128], index: 1, kind: input, shape index: {}]   ;;  %s1722_s2 = inlined_call_operand.hbm [shape: f32[384,128], index: 2, kind: input, shape index: {}]   ;;  %s1723_s3 = inlined_call_operand.vmem [shape: f32[4,8], index: 3, kind: input, shape index: {}]   ;;  %s1724_s4 = inlined_call_operand.vmem [shape: f32[128,8], index: 4, kind: input, shape index: {}]   ;;  %s1725_s5 = inlined_call_operand.vmem [shape: f32[8,128], index: 5, kind: input, shape index: {}]   ;;  %s1726_s6 = inlined_call_operand.hbm [shape: f32[2,16,128], index: 6, kind: output, shape index: {}]  }
   0x1   :  { %12 = vsyncpa [#allocation5], 0  ;;  %s1331_s21 = smov [#allocation3]   ;;  %s1283_s25 = scalar_lea.hbm %s1722_s2, 6144 }
   0x2   :  { %s22_s22 = sshll.u32 %s1331_s21, 4  ;;  %p1284_p0 = scmp.ne.s32.totalorder %s1722_s2, %s1283_s25  ;;  %s23_s22 = int_to_ptr.vmem [resolvable:$true] %s22_s22 }
   0x3   :  { %p1287_p1 = scmp.lt.u32.totalorder %s1283_s25, %s1722_s2 }
   0x5   :  { %p1289_p2 = pnand %p1287_p1, %p1284_p0 }
   0x7   :  { %1292 = shalt.err (!%p1289_p2)
}
   0x8   :  { %s1293_s30 = scalar_lea.vmem %s23_s22, 6144  ;;  %p1298_p4 = scmp.lt.s32.totalorder %s23_s22, %s23_s22 }
   0x9   :  { %p1294_p3 = scmp.ne.s32.totalorder %s23_s22, %s1293_s30  ;;  %p1299_p5 = scmp.lt.s32.totalorder %s1293_s30, %s1293_s30 }
   0xb   :  { %p1300_p6 = por %p1299_p5, %p1298_p4 }
   0xd   :  { %p1301_p7 = pnand %p1300_p6, %p1294_p3 }
   0xf   :  { %1304 = shalt.err (!%p1301_p7)
}
  0x10   :  { %s1332_s7 = smov 128   ;;  %s1333_s8 = smov 8  }
  0x11   :  { %28 = dma.hbm_to_vmem [thread:$0]  %s1722_s2, 6144, %s23_s22, [#allocation4], %s1332_s7, %s1332_s7, %s1333_s8  }
  0x12   :  { %1327 = dma.done.wait [#allocation4], 6144  }
  0x13   :  { %1328 = vsyncadd [#allocation4], 4294961152  ;;  %v1334_v0 = vmov 0.0|0.0   ;;  %v1394_v1 = vld [vmem:[%s1720_s0] sm:$0xff]  ;;  %v1399_v2 = vld [vmem:[%s1720_s0 + $0x8] sm:$0xff]  ;;  %vm68_vm0 = vcmask 1046528  }
  0x14   :  { %1123 = vmatprep.subr.bf16.mxu0 %v1334_v0  ;;  %1159 = vmatprep.subr.bf16.mxu1 %v1334_v0  ;;  %v58_v3 = vld [vmem:[%s1720_s0 + $0x10] sm:$0x3]  ;;  %v69_v4 = vrot.slane %v1394_v1, 1  ;;  %v70_v5 = vrot.slane %v1399_v2, 1  ;;  %v1409_v7 = vld [vmem:[%s1720_s0 + $0x18] sm:$0xff]  ;;  %v1414_v8 = vld [vmem:[%s1720_s0 + $0x20] sm:$0xff] }
  0x15   :  { %v72_v6 = vrot.slane %v58_v3, 1  ;;  %v107_v9 = vld [vmem:[%s1721_s1] sm:$0xff]  ;;  %v74_v10 = vrot.slane %v1409_v7, 1  ;;  %v75_v11 = vrot.slane %v1414_v8, 1  ;;  %v61_v12 = vld [vmem:[%s1720_s0 + $0x28] sm:$0x3] }
  0x16   :  { %v108_v13 = vld [vmem:[%s1721_s1 + $0x8] sm:$0xff]  ;;  %v109_v14 = vld [vmem:[%s1721_s1 + $0x10] sm:$0xff]  ;;  %v71_v15 = vsel %vm68_vm0, %v69_v4, %v70_v5  ;;  %v77_v16 = vrot.slane %v61_v12, 1  ;;  %v110_v18 = vld [vmem:[%s1721_s1 + $0x18] sm:$0xff]  ;;  %s1335_s30 = smov 64   ;;  %vm91_vm1 = vcmask 1045504  }
  0x17   :  { %v1124_v17 = vpack.c.bf16 %v108_v13, %v107_v9  ;;  %79 = vrot.lane.b32.xlu0 %v71_v15, %s1335_s30  ;;  %v76_v19 = vsel %vm68_vm0, %v74_v10, %v75_v11  ;;  %v92_v20 = vrot.slane %v1394_v1, 2  ;;  %vm102_vm2 = vcmask 523264   ;;  %v111_v26 = vld [vmem:[%s1721_s1 + $0x20] sm:$0xff]  ;;  %v112_v27 = vld [vmem:[%s1721_s1 + $0x28] sm:$0xff]  ;;  %v113_v33 = vld [vmem:[%s1721_s1 + $0x30] sm:$0xff] }
  0x18   :  { %v73_v21 = vsel %vm68_vm0, %v70_v5, %v72_v6  ;;  %83 = vrot.lane.b32.xlu1 %v76_v19, %s1335_s30  ;;  %v1127_v22 = vpack.c.bf16 %v110_v18, %v109_v14  ;;  %v93_v23 = vrot.slane %v1399_v2, 2  ;;  %v95_v24 = vrot.slane %v58_v3, 2  ;;  %v114_v35 = vld [vmem:[%s1721_s1 + $0x38] sm:$0xff]  ;;  %v38_v36 = vld [vmem:[%s1724_s4] sm:$0xff]  ;;  %v39_v37 = vld [vmem:[%s1724_s4 + $0x8] sm:$0xff] }
  0x19   :  { %1125 = vmatpush1.bf16.msra.mxu0 %v1124_v17  ;;  %v78_v25 = vsel %vm68_vm0, %v75_v11, %v77_v16  ;;  %v98_v30 = vrot.slane %v1414_v8, 2  ;;  %v100_v31 = vrot.slane %v61_v12, 2  ;;  %v1130_v32 = vpack.c.bf16 %v112_v27, %v111_v26  ;;  %v115_v40 = vld [vmem:[%s1721_s1 + $0x40] sm:$0xff]  ;;  %v116_v41 = vld [vmem:[%s1721_s1 + $0x48] sm:$0xff]  ;;  %v117_v43 = vld [vmem:[%s1721_s1 + $0x50] sm:$0xff] }
  0x1a   :  { %1126 = vmatprep.subr.bf16.mxu0 %v1334_v0  ;;  %v94_v28 = vsel %vm91_vm1, %v92_v20, %v93_v23  ;;  %v1448_v29 = vsel %vm91_vm1, %v93_v23, %v95_v24  ;;  %v1470_v38 = vpack.c.bf16 %v39_v37, %v38_v36  ;;  %v1133_v39 = vpack.c.bf16 %v114_v35, %v113_v33  ;;  %v118_v44 = vld [vmem:[%s1721_s1 + $0x58] sm:$0xff]  ;;  %v119_v46 = vld [vmem:[%s1721_s1 + $0x60] sm:$0xff]  ;;  %v120_v47 = vld [vmem:[%s1721_s1 + $0x68] sm:$0xff] }
  0x1b   :  { %81 = vrot.lane.b32.xlu0 %v73_v21, %s1335_s30  ;;  %897 = vmatprep.mubr.msk.f32.mxu0 %vm102_vm2, %v94_v28  ;;  %v1458_v34 = vsel %vm91_vm1, %v98_v30, %v100_v31  ;;  %v1136_v42 = vpack.c.bf16 %v116_v41, %v115_v40  ;;  %v1139_v45 = vpack.c.bf16 %v118_v44, %v117_v43  ;;  %v121_v49 = vld [vmem:[%s1721_s1 + $0x70] sm:$0xff]  ;;  %v122_v50 = vld [vmem:[%s1721_s1 + $0x78] sm:$0xff]  ;;  %v123_v52 = vld [vmem:[%s1721_s1 + $0x80] sm:$0xff]  ;;  %v97_v4 = vrot.slane %v1409_v7, 2 }
  0x1c   :  { %85 = vrot.lane.b32.xlu1 %v78_v25, %s1335_s30  ;;  %1161 = vmatpush3.bf16.msra.mxu1 %v1470_v38  ;;  %v1142_v48 = vpack.c.bf16 %v120_v47, %v119_v46  ;;  %v1145_v51 = vpack.c.bf16 %v122_v50, %v121_v49  ;;  %v124_v53 = vld [vmem:[%s1721_s1 + $0x88] sm:$0xff]  ;;  %v125_v55 = vld [vmem:[%s1721_s1 + $0x90] sm:$0xff]  ;;  %v126_v56 = vld [vmem:[%s1721_s1 + $0x98] sm:$0xff]  ;;  %vm1336_vm3 = vmmov 0   ;;  %v1337_v31 = vmov 0.0  }
  0x1d   :  { %1128 = vmatpush1.bf16.msra.mxu0 %v1127_v22  ;;  %1162 = vmatprep.subr.bf16.mxu1 %v1334_v0  ;;  %v1148_v54 = vpack.c.bf16 %v124_v53, %v123_v52  ;;  %v1151_v57 = vpack.c.bf16 %v126_v56, %v125_v55  ;;  %v127_v58 = vld [vmem:[%s1721_s1 + $0xa0] sm:$0xff]  ;;  %v128_v59 = vld [vmem:[%s1721_s1 + $0xa8] sm:$0xff]  ;;  %v129_v61 = vld [vmem:[%s1721_s1 + $0xb0] sm:$0xff]  ;;  %v99_v10 = vsel %vm91_vm1, %v97_v4, %v98_v30  ;;  %vm246_vm4 = vcmask 1040384  }
  0x1e   :  { %1129 = vmatprep.subr.bf16.mxu0 %v1334_v0  ;;  %v1154_v60 = vpack.c.bf16 %v128_v59, %v127_v58  ;;  %v130_v62 = vld [vmem:[%s1721_s1 + $0xb8] sm:$0xff]  ;;  %v40_v14 = vld [vmem:[%s1724_s4 + $0x10] sm:$0xff]  ;;  %v46_v20 = vld [vmem:[%s1724_s4 + $0x40] sm:$0xff]  ;;  %1037 = vmatprep.mubr.msk.f32.mxu1 %vm1336_vm3, %v1337_v31  ;;  %429 = vst [vmem:[#allocation2 + $0x7] sm:$0x1] %v1337_v31  ;;  %vm335_vm5 = vcmask 64512  }
  0x1f   :  { %v1157_v63 = vpack.c.bf16 %v130_v62, %v129_v61  ;;  %v44_v17 = vld [vmem:[%s1724_s4 + $0x30] sm:$0xff]  ;;  %v45_v18 = vld [vmem:[%s1724_s4 + $0x38] sm:$0xff]  ;;  %v47_v21 = vld [vmem:[%s1724_s4 + $0x48] sm:$0xff]  ;;  %430 = vst [vmem:[#allocation2 + $0x27] sm:$0x1] %v1337_v31 }
  0x20   :  { %v1574_v19 = vpack.c.bf16 %v45_v18, %v44_v17  ;;  %v1584_v22 = vpack.c.bf16 %v47_v21, %v46_v20  ;;  %v48_v23 = vld [vmem:[%s1724_s4 + $0x50] sm:$0xff]  ;;  %v49_v24 = vld [vmem:[%s1724_s4 + $0x58] sm:$0xff]  ;;  %v50_v26 = vld [vmem:[%s1724_s4 + $0x60] sm:$0xff]  ;;  %431 = vst [vmem:[#allocation2 + $0x18] sm:$0x1] %v1337_v31 }
  0x21   :  { %1131 = vmatpush1.bf16.msra.mxu0 %v1130_v32  ;;  %v1594_v25 = vpack.c.bf16 %v49_v24, %v48_v23  ;;  %v51_v27 = vld [vmem:[%s1724_s4 + $0x68] sm:$0xff]  ;;  %v53_v30 = vld [vmem:[%s1724_s4 + $0x78] sm:$0xff]  ;;  %432 = vst [vmem:[#allocation2 + $0x38] sm:$0x1] %v1337_v31  ;;  %v1650_v4 = vld [vmem:[%s1725_s5] sm:$0xff] }
  0x22   :  { %1132 = vmatprep.subr.bf16.mxu0 %v1334_v0  ;;  %v1604_v28 = vpack.c.bf16 %v51_v27, %v50_v26  ;;  %v487_v17 = vld [vmem:[#allocation3 + $0x130] sm:$0xff]  ;;  %v488_v18 = vld [vmem:[#allocation3 + $0x138] sm:$0xff] }
  0x23   :  { %v1227_v20 = vpack.c.bf16 %v488_v18, %v487_v17  ;;  %v491_v18 = vld [vmem:[#allocation3 + $0x150] sm:$0xff] }
  0x25   :  { %1134 = vmatpush1.bf16.msra.mxu0 %v1133_v39 }
  0x26   :  { %1135 = vmatprep.subr.bf16.mxu0 %v1334_v0 }
  0x29   :  { %1137 = vmatpush1.bf16.msra.mxu0 %v1136_v42 }
  0x2a   :  { %1138 = vmatprep.subr.bf16.mxu0 %v1334_v0 }
  0x2d   :  { %1140 = vmatpush1.bf16.msra.mxu0 %v1139_v45 }
  0x2e   :  { %1141 = vmatprep.subr.bf16.mxu0 %v1334_v0 }
  0x31   :  { %1143 = vmatpush1.bf16.msra.mxu0 %v1142_v48 }
  0x32   :  { %1144 = vmatprep.subr.bf16.mxu0 %v1334_v0 }
  0x35   :  { %1146 = vmatpush1.bf16.msra.mxu0 %v1145_v51 }
  0x36   :  { %1147 = vmatprep.subr.bf16.mxu0 %v1334_v0 }
  0x39   :  { %1149 = vmatpush1.bf16.msra.mxu0 %v1148_v54 }
  0x3a   :  { %1150 = vmatprep.subr.bf16.mxu0 %v1334_v0 }
  0x3d   :  { %1152 = vmatpush1.bf16.msra.mxu0 %v1151_v57 }
  0x3e   :  { %1153 = vmatprep.subr.bf16.mxu0 %v1334_v0 }
  0x41   :  { %1155 = vmatpush1.bf16.msra.mxu0 %v1154_v60 }
  0x42   :  { %1156 = vmatprep.subr.bf16.mxu0 %v1334_v0 }
  0x45   :  { %1158 = vmatpush1.bf16.msra.mxu0 %v1157_v63 }
  0x89   :  { %v80_v3 = vpop.permute.xlu0 %79 }
  0x8a   :  { %v103_v5 = vsel %vm102_vm2, %v1394_v1, %v80_v3  ;;  %v84_v6 = vpop.permute.xlu1 %83 }
  0x8b   :  { %204 = vmatmul.mubr.f32.vlgmr.msra.gmra.mrb[0].mxu0 %v103_v5  ;;  %v105_v12 = vsel %vm102_vm2, %v1409_v7, %v84_v6  ;;  %v42_v7 = vld [vmem:[%s1724_s4 + $0x20] sm:$0xff]  ;;  %v465_v5 = vld [vmem:[#allocation3 + $0x80] sm:$0xff]  ;;  %v466_v6 = vld [vmem:[#allocation3 + $0x88] sm:$0xff] }
  0x8c   :  { %898 = vmatprep.mubr.msk.f32.mxu0 %vm102_vm2, %v1448_v29  ;;  %v52_v29 = vld [vmem:[%s1724_s4 + $0x70] sm:$0xff] }
  0x8d   :  { %v82_v9 = vpop.permute.xlu0 %81  ;;  %v1619_v32 = vpack.c.bf16 %v53_v30, %v52_v29 }
  0x8e   :  { %v104_v11 = vsel %vm102_vm2, %v1399_v2, %v82_v9  ;;  %v86_v1 = vpop.permute.xlu1 %85  ;;  %v41_v2 = vld [vmem:[%s1724_s4 + $0x18] sm:$0xff]  ;;  %v481_v9 = vld [vmem:[#allocation3 + $0x100] sm:$0xff] }
  0x8f   :  { %209 = vmatmul.mubr.f32.gmra.mrb[2].mxu0 %v104_v11  ;;  %v106_v13 = vsel %vm102_vm2, %v1414_v8, %v86_v1  ;;  %v1554_v15 = vpack.c.bf16 %v41_v2, %v40_v14  ;;  %v43_v8 = vld [vmem:[%s1724_s4 + $0x28] sm:$0xff]  ;;  %v482_v11 = vld [vmem:[#allocation3 + $0x108] sm:$0xff]  ;;  %v483_v1 = vld [vmem:[#allocation3 + $0x110] sm:$0xff] }
  0x90   :  { %899 = vmatprep.mubr.msk.f32.mxu0 %vm102_vm2, %v99_v10  ;;  %v1564_v16 = vpack.c.bf16 %v43_v8, %v42_v7  ;;  %v1183_v10 = vpack.c.bf16 %v466_v6, %v465_v5  ;;  %v485_v2 = vld [vmem:[#allocation3 + $0x120] sm:$0xff]  ;;  %v486_v7 = vld [vmem:[#allocation3 + $0x128] sm:$0xff] }
  0x91   :  { %1164 = vmatpush3.bf16.msra.mxu1 %v1554_v15  ;;  %v1223_v8 = vpack.c.bf16 %v486_v7, %v485_v2  ;;  %v473_v6 = vld [vmem:[#allocation3 + $0xc0] sm:$0xff]  ;;  %v475_v7 = vld [vmem:[#allocation3 + $0xd0] sm:$0xff] }
  0x92   :  { %1165 = vmatprep.subr.bf16.mxu1 %v1334_v0 }
  0x93   :  { %214 = vmatmul.mubr.f32.gmra.mrb[4].mxu0 %v105_v12  ;;  %v1215_v12 = vpack.c.bf16 %v482_v11, %v481_v9  ;;  %v474_v9 = vld [vmem:[#allocation3 + $0xc8] sm:$0xff]  ;;  %v489_v11 = vld [vmem:[#allocation3 + $0x140] sm:$0xff] }
  0x94   :  { %900 = vmatprep.mubr.msk.f32.mxu0 %vm102_vm2, %v1458_v34 }
  0x95   :  { %1167 = vmatpush3.bf16.msra.mxu1 %v1564_v16  ;;  %1216 = vmatprep.subr.bf16.mxu0 %v1215_v12 }
  0x96   :  { %1168 = vmatprep.subr.bf16.mxu1 %v1334_v0  ;;  %1218 = vmatpush3.bf16.msra.mxu0 %v1215_v12  ;;  %v490_v12 = vld [vmem:[#allocation3 + $0x148] sm:$0xff] }
  0x97   :  { %219 = vmatmul.mubr.f32.gmra.mrb[6].mxu0 %v106_v13  ;;  %v484_v13 = vld [vmem:[#allocation3 + $0x118] sm:$0xff] }
  0x98   :  { %v1219_v14 = vpack.c.bf16 %v484_v13, %v483_v1  ;;  %v457_v1 = vld [vmem:[#allocation3 + $0x40] sm:$0xff]  ;;  %v1231_v13 = vpack.c.bf16 %v490_v12, %v489_v11 }
  0x99   :  { %1170 = vmatpush3.bf16.msra.mxu1 %v1574_v19 }
  0x9a   :  { %1171 = vmatprep.subr.bf16.mxu1 %v1334_v0  ;;  %1220 = vmatprep.subr.bf16.mxu0 %v1219_v14 }
  0x9b   :  { %1222 = vmatpush3.bf16.msra.mxu0 %v1219_v14  ;;  %v458_v14 = vld [vmem:[#allocation3 + $0x48] sm:$0xff] }
  0x9c   :  { %1224 = vmatprep.subr.bf16.mxu0 %v1223_v8  ;;  %v1201_v2 = vpack.c.bf16 %v458_v14, %v457_v1 }
  0x9d   :  { %1173 = vmatpush3.bf16.msra.mxu1 %v1584_v22 }
  0x9e   :  { %1174 = vmatprep.subr.bf16.mxu1 %v1334_v0 }
  0x9f   :  { %1226 = vmatpush3.bf16.msra.mxu0 %v1223_v8  ;;  %v476_v8 = vld [vmem:[#allocation3 + $0xd8] sm:$0xff] }
  0xa0   :  { %1228 = vmatprep.subr.bf16.mxu0 %v1227_v20  ;;  %v1203_v17 = vpack.c.bf16 %v476_v8, %v475_v7 }
  0xa1   :  { %1176 = vmatpush3.bf16.msra.mxu1 %v1594_v25 }
  0xa2   :  { %1177 = vmatprep.subr.bf16.mxu1 %v1334_v0 }
  0xa3   :  { %1230 = vmatpush3.bf16.msra.mxu0 %v1227_v20  ;;  %v492_v20 = vld [vmem:[#allocation3 + $0x158] sm:$0xff] }
  0xa4   :  { %1232 = vmatprep.subr.bf16.mxu0 %v1231_v13 }
  0xa5   :  { %1179 = vmatpush3.bf16.msra.mxu1 %v1604_v28 }
  0xa6   :  { %1180 = vmatprep.subr.bf16.mxu1 %v1334_v0 }
  0xa7   :  { %1234 = vmatpush3.bf16.msra.mxu0 %v1231_v13 }
  0xa9   :  { %1182 = vmatpush3.bf16.msra.mxu1 %v1619_v32 }
  0xaa   :  { %1040 = vmatprep.subr.mxu1 %v1337_v31 }
 0x15e   :  { %v1624_v33 = vpop.f32.mrb[0].mxu0 }
 0x15f   :  { %v207_v34 = vpop.f32.mrb[1].mxu0  ;;  %v233_v36 = vmul.f32 %v1624_v33, %v1624_v33 }
 0x160   :  { %v1656_v34 = vld [vmem:[%s1723_s3] sm:$0xf]  ;;  %s1338_s3 = smov [#allocation6]  }
 0x161   :  { %s885_s0 = sshll.u32 %s1338_s3, 4  ;;  %s886_s0 = int_to_ptr.vmem [resolvable:$true] %s885_s0 }
 0x162   :  { %v1626_v35 = vpop.f32.mrb[2].mxu0  ;;  %s1305_s9 = scalar_lea.vmem %s886_s0, 512  ;;  %p1310_p9 = scmp.lt.s32.totalorder %s886_s0, %s886_s0 }
 0x163   :  { %v224_v37 = vadd.f32 %v1626_v35, %v1624_v33  ;;  %v234_v39 = vmul.f32 %v1626_v35, %v1626_v35  ;;  %v212_v40 = vpop.f32.mrb[3].mxu0  ;;  %p1306_p8 = scmp.ne.s32.totalorder %s886_s0, %s1305_s9  ;;  %p1311_p10 = scmp.lt.s32.totalorder %s1305_s9, %s1305_s9 }
 0x164   :  { %v449_v40 = vld [vmem:[#allocation3] sm:$0xff] }
 0x165   :  { %v237_v41 = vadd.f32 %v234_v39, %v233_v36  ;;  %p1312_p11 = por %p1311_p10, %p1310_p9 }
 0x166   :  { %v1634_v42 = vpop.f32.mrb[4].mxu0 }
 0x167   :  { %v225_v43 = vadd.f32 %v224_v37, %v1634_v42  ;;  %v235_v44 = vmul.f32 %v1634_v42, %v1634_v42  ;;  %v217_v45 = vpop.f32.mrb[5].mxu0  ;;  %p1313_p12 = pnand %p1312_p11, %p1306_p8 }
 0x168   :  { %v468_v45 = vld [vmem:[#allocation3 + $0x98] sm:$0xff] }
 0x169   :  { %v238_v46 = vadd.f32 %v237_v41, %v235_v44  ;;  %v450_v41 = vld [vmem:[#allocation3 + $0x8] sm:$0xff]  ;;  %v467_v44 = vld [vmem:[#allocation3 + $0x90] sm:$0xff] }
 0x16a   :  { %v1639_v47 = vpop.f32.mrb[6].mxu0 }
 0x16b   :  { %v226_v48 = vadd.f32 %v225_v43, %v1639_v47  ;;  %v236_v49 = vmul.f32 %v1639_v47, %v1639_v47  ;;  %v222_v50 = vpop.f32.mrb[7].mxu0 }
 0x16c   :  { %v451_v50 = vld [vmem:[#allocation3 + $0x10] sm:$0xff] }
 0x16d   :  { %v227_v51 = vrot.slane %v226_v48, 4  ;;  %v239_v52 = vadd.f32 %v238_v46, %v236_v49  ;;  %v1187_v49 = vpack.c.bf16 %v468_v45, %v467_v44  ;;  %v479_v44 = vld [vmem:[#allocation3 + $0xf0] sm:$0xff]  ;;  %v480_v45 = vld [vmem:[#allocation3 + $0xf8] sm:$0xff] }
 0x16f   :  { %v228_v53 = vadd.f32 %v227_v51, %v226_v48  ;;  %v240_v54 = vrot.slane %v239_v52, 4  ;;  %v1185_v48 = vpack.c.bf16 %v450_v41, %v449_v40  ;;  %v452_v51 = vld [vmem:[#allocation3 + $0x18] sm:$0xff]  ;;  %v462_v41 = vld [vmem:[#allocation3 + $0x68] sm:$0xff] }
 0x171   :  { %v229_v55 = vrot.slane %v228_v53, 2  ;;  %v241_v56 = vadd.f32 %v240_v54, %v239_v52  ;;  %v470_v54 = vld [vmem:[#allocation3 + $0xa8] sm:$0xff] }
 0x173   :  { %v230_v57 = vadd.f32 %v229_v55, %v228_v53  ;;  %v242_v58 = vrot.slane %v241_v56, 2  ;;  %v469_v53 = vld [vmem:[#allocation3 + $0xa0] sm:$0xff]  ;;  %v1189_v55 = vpack.c.bf16 %v452_v51, %v451_v50  ;;  %v463_v50 = vld [vmem:[#allocation3 + $0x70] sm:$0xff]  ;;  %v464_v51 = vld [vmem:[#allocation3 + $0x78] sm:$0xff] }
 0x175   :  { %v231_v59 = vrot.slane %v230_v57, 1  ;;  %v243_v60 = vadd.f32 %v242_v58, %v241_v56  ;;  %v1191_v56 = vpack.c.bf16 %v470_v54, %v469_v53  ;;  %v454_v58 = vld [vmem:[#allocation3 + $0x28] sm:$0xff]  ;;  %v1213_v53 = vpack.c.bf16 %v464_v51, %v463_v50 }
 0x176   :  { %v409_v54 = vlaneseq }
 0x177   :  { %v244_v61 = vrot.slane %v243_v60, 1  ;;  %v232_v62 = vadd.f32 %v231_v59, %v230_v57  ;;  %v453_v57 = vld [vmem:[#allocation3 + $0x20] sm:$0xff]  ;;  %v471_v59 = vld [vmem:[#allocation3 + $0xb0] sm:$0xff] }
 0x179   :  { %v245_v63 = vadd.f32 %v244_v61, %v243_v60  ;;  %v472_v60 = vld [vmem:[#allocation3 + $0xb8] sm:$0xff]  ;;  %v1193_v61 = vpack.c.bf16 %v454_v58, %v453_v57 }
 0x17b   :  { %v247_v3 = vsel %vm246_vm4, %v232_v62, %v245_v63  ;;  %v1195_v62 = vpack.c.bf16 %v472_v60, %v471_v59  ;;  %v455_v63 = vld [vmem:[#allocation3 + $0x30] sm:$0xff] }
 0x17c   :  { %1038 = vmatmul.mubr.f32.vlgmr.msra.gmra.mrb[0].mxu1 %v247_v3  ;;  %v456_v3 = vld [vmem:[#allocation3 + $0x38] sm:$0xff] }
 0x17d   :  { %1042 = vmatprep.mubr.msk.f32.mxu1 %vm1336_vm3, %v1337_v31  ;;  %1041 = vmatpush3.msra.mxu1 %v1650_v4  ;;  %v1197_v5 = vpack.c.bf16 %v456_v3, %v455_v63 }
 0x17e   :  { %1184 = vmatprep.subr.bf16.mxu1 %v1183_v10  ;;  %v1199_v10 = vpack.c.bf16 %v474_v9, %v473_v6 }
 0x24f   :  { %v314_v21 = vpop.f32.mrb[0].mxu1 }
 0x250   :  { %v318_v23 = vmul.f32 %v314_v21, %v314_v21  ;;  %v1039_v24 = vpop.f32.mrb[1].mxu1 }
 0x251   :  { %v460_v24 = vld [vmem:[#allocation3 + $0x58] sm:$0xff] }
 0x252   :  { %v320_v26 = vrot.slane %v318_v23, 7  ;;  %v1235_v23 = vpack.c.bf16 %v492_v20, %v491_v18 }
 0x254   :  { %v322_v27 = vsub.f32 %v314_v21, %v320_v26  ;;  %1236 = vmatprep.subr.bf16.mxu0 %v1235_v23 }
 0x255   :  { %1238 = vmatpush3.bf16.msra.mxu0 %v1235_v23 }
 0x256   :  { %v323_v29 = vadd.f32 1e-05, %v322_v27  ;;  %v477_v27 = vld [vmem:[#allocation3 + $0xe0] sm:$0xff] }
 0x258   :  { %1279 = vrsqrt.f32 %v323_v29  ;;  %v478_v29 = vld [vmem:[#allocation3 + $0xe8] sm:$0xff] }
 0x262   :  { %v1280_v30 = vpop.eup %1279 }
 0x263   :  { %v326_v36 = vrot.slane %v1280_v30, 1  ;;  %v1207_v30 = vpack.c.bf16 %v478_v29, %v477_v27 }
 0x265   :  { %v328_v37 = vmul.f32 %v326_v36, %v1656_v34  ;;  %v493_v36 = vld [vmem:[#allocation3 + $0x160] sm:$0xff] }
 0x267   :  { %v329_v39 = vmul.f32 %v328_v37, %v314_v21  ;;  %v459_v21 = vld [vmem:[#allocation3 + $0x50] sm:$0xff] }
 0x268   :  { %v1205_v26 = vpack.c.bf16 %v460_v24, %v459_v21 }
 0x269   :  { %v331_v43 = vrot.slane %v329_v39, 7  ;;  %v461_v39 = vld [vmem:[#allocation3 + $0x60] sm:$0xff] }
 0x26b   :  { %v333_v46 = vsub.f32 %v1656_v34, %v331_v43  ;;  %v1209_v43 = vpack.c.bf16 %v462_v41, %v461_v39 }
 0x26d   :  { %v334_v52 = vsel %vm246_vm4, %v328_v37, %v333_v46  ;;  %v494_v37 = vld [vmem:[#allocation3 + $0x168] sm:$0xff]  ;;  %v495_v46 = vld [vmem:[#allocation3 + $0x170] sm:$0xff] }
 0x26e   :  { %1043 = vmatmul.mubr.msk.f32.vlgmr.msra.gmra.mrb[2].mxu1 %vm335_vm5, %v334_v52  ;;  %v1239_v40 = vpack.c.bf16 %v494_v37, %v493_v36 }
 0x26f   :  { %1186 = vmatpush3.bf16.msra.mxu1 %v1185_v48  ;;  %v1211_v48 = vpack.c.bf16 %v480_v45, %v479_v44 }
 0x270   :  { %1188 = vmatprep.subr.bf16.mxu1 %v1187_v49  ;;  %1240 = vmatprep.subr.bf16.mxu0 %v1239_v40  ;;  %v496_v49 = vld [vmem:[#allocation3 + $0x178] sm:$0xff] }
 0x271   :  { %1242 = vmatpush3.bf16.msra.mxu0 %v1239_v40  ;;  %v1243_v52 = vpack.c.bf16 %v496_v49, %v495_v46 }
 0x273   :  { %1190 = vmatpush3.bf16.msra.mxu1 %v1189_v55  ;;  %1244 = vmatprep.subr.bf16.mxu0 %v1243_v52  ;;  %v1664_v55 = vshrl.u32 %v409_v54, 7 }
 0x274   :  { %1192 = vmatprep.subr.bf16.mxu1 %v1191_v56 }
 0x275   :  { %1246 = vmatpush3.bf16.msra.mxu0 %v1243_v52  ;;  %v411_v56 = vsub.s32 0, %v1664_v55  ;;  %v419_v57 = vsub.s32 1, %v1664_v55 }
 0x276   :  { %1118 = vmatprep.subr.mxu0 %v1337_v31 }
 0x277   :  { %1194 = vmatpush3.bf16.msra.mxu1 %v1193_v61 }
 0x278   :  { %1196 = vmatprep.subr.bf16.mxu1 %v1195_v62 }
 0x27b   :  { %1198 = vmatpush3.bf16.msra.mxu1 %v1197_v5 }
 0x27c   :  { %1200 = vmatprep.subr.bf16.mxu1 %v1199_v10 }
 0x27f   :  { %1202 = vmatpush3.bf16.msra.mxu1 %v1201_v2 }
 0x280   :  { %1204 = vmatprep.subr.bf16.mxu1 %v1203_v17 }
 0x283   :  { %1206 = vmatpush3.bf16.msra.mxu1 %v1205_v26 }
 0x284   :  { %1208 = vmatprep.subr.bf16.mxu1 %v1207_v30 }
 0x287   :  { %1210 = vmatpush3.bf16.msra.mxu1 %v1209_v43 }
 0x288   :  { %1212 = vmatprep.subr.bf16.mxu1 %v1211_v48 }
 0x28b   :  { %1214 = vmatpush3.bf16.msra.mxu1 %v1213_v53 }
 0x28c   :  { %1247 = vmatprep.subr.bf16.mxu1 %v1334_v0 }
 0x341   :  { %v405_v58 = vpop.f32.mrb[2].mxu1 }
 0x342   :  { %v412_v59 = vrot.slane %v405_v58, %v411_v56  ;;  %v1044_v60 = vpop.f32.mrb[3].mxu1  ;;  %v420_v61 = vrot.slane %v405_v58, %v419_v57 }
 0x344   :  { %v413_v62 = vmul.f32 %v412_v59, %v1624_v33  ;;  %v414_v63 = vmul.f32 %v412_v59, %v1626_v35  ;;  %v415_v3 = vmul.f32 %v412_v59, %v1634_v42  ;;  %v416_v5 = vmul.f32 %v412_v59, %v1639_v47 }
 0x346   :  { %v421_v6 = vadd.f32 %v420_v61, %v413_v62  ;;  %v422_v9 = vadd.f32 %v420_v61, %v414_v63  ;;  %v423_v10 = vadd.f32 %v420_v61, %v415_v3  ;;  %v424_v11 = vadd.f32 %v420_v61, %v416_v5 }
 0x348   :  { %v425_v12 = vmax.f32 %v421_v6, 0.0  ;;  %v426_v1 = vmax.f32 %v422_v9, 0.0  ;;  %v427_v13 = vmax.f32 %v423_v10, 0.0  ;;  %v428_v14 = vmax.f32 %v424_v11, 0.0 }
 0x34a   :  { %433 = vst [vmem:[#allocation2 + $0x8] sm:$0xff] %v425_v12  ;;  %434 = vst [vmem:[#allocation2 + $0x10] sm:$0xff] %v426_v1  ;;  %561 = vmatprep.mubr.f32.mxu1 %v425_v12 }
 0x34b   :  { %435 = vst [vmem:[#allocation2 + $0x28] sm:$0xff] %v427_v13  ;;  %436 = vst [vmem:[#allocation2 + $0x30] sm:$0xff] %v428_v14 }
 0x351   :  { %v445_v33 = vld [vmem:[#allocation2 + $0x9] sm:$0xff]  ;;  %v446_v35 = vld [vmem:[#allocation2 + $0x11] sm:$0xff] }
 0x352   :  { %v437_v2 = vld [vmem:[#allocation2 + $0x7] sm:$0xff]  ;;  %1077 = vmatprep.mubr.f32.mxu0 %v445_v33  ;;  %v438_v47 = vld [vmem:[#allocation2 + $0xf] sm:$0xff] }
 0x353   :  { %562 = vmatmul.mubr.f32.vlgmr.msra.gmra.mrb[4].mxu1 %v437_v2  ;;  %1078 = vmatmul.mubr.f32.vlgmr.msra.gmra.mrb[8].mxu0 %v446_v35  ;;  %v447_v42 = vld [vmem:[#allocation2 + $0x29] sm:$0xff]  ;;  %v448_v7 = vld [vmem:[#allocation2 + $0x31] sm:$0xff] }
 0x354   :  { %566 = vmatprep.mubr.f32.mxu1 %v426_v1  ;;  %1080 = vmatprep.mubr.f32.mxu0 %v447_v42  ;;  %v439_v8 = vld [vmem:[#allocation2 + $0x27] sm:$0xff] }
 0x355   :  { %1249 = vmatpush3.bf16.msra.mxu1 %v1470_v38  ;;  %1119 = vmatpush3.msra.mxu0 %v1650_v4  ;;  %v440_v38 = vld [vmem:[#allocation2 + $0x2f] sm:$0xff] }
 0x356   :  { %1250 = vmatprep.subr.bf16.mxu1 %v1334_v0 }
 0x357   :  { %567 = vmatmul.mubr.f32.gmra.mrb[6].mxu1 %v438_v47  ;;  %1081 = vmatmul.mubr.f32.gmra.mrb[10].mxu0 %v448_v7 }
 0x358   :  { %571 = vmatprep.mubr.f32.mxu1 %v427_v13  ;;  %1120 = vmatprep.mubr.msk.f32.mxu0 %vm1336_vm3, %v1337_v31 }
 0x359   :  { %1252 = vmatpush3.bf16.msra.mxu1 %v1554_v15 }
 0x35a   :  { %1253 = vmatprep.subr.bf16.mxu1 %v1334_v0 }
 0x35b   :  { %572 = vmatmul.mubr.f32.gmra.mrb[8].mxu1 %v439_v8 }
 0x35c   :  { %576 = vmatprep.mubr.f32.mxu1 %v428_v14 }
 0x35d   :  { %1255 = vmatpush3.bf16.msra.mxu1 %v1564_v16 }
 0x35e   :  { %1256 = vmatprep.subr.bf16.mxu1 %v1334_v0 }
 0x35f   :  { %577 = vmatmul.mubr.f32.gmra.mrb[10].mxu1 %v440_v38 }
 0x360   :  { %1115 = vmatprep.mubr.msk.f32.mxu1 %vm1336_vm3, %v1337_v31 }
 0x361   :  { %1258 = vmatpush3.bf16.msra.mxu1 %v1574_v19 }
 0x362   :  { %1259 = vmatprep.subr.bf16.mxu1 %v1334_v0 }
 0x365   :  { %1261 = vmatpush3.bf16.msra.mxu1 %v1584_v22 }
 0x366   :  { %1262 = vmatprep.subr.bf16.mxu1 %v1334_v0 }
 0x369   :  { %1264 = vmatpush3.bf16.msra.mxu1 %v1594_v25 }
 0x36a   :  { %1265 = vmatprep.subr.bf16.mxu1 %v1334_v0 }
 0x36d   :  { %1267 = vmatpush3.bf16.msra.mxu1 %v1604_v28 }
 0x36e   :  { %1268 = vmatprep.subr.bf16.mxu1 %v1334_v0 }
 0x371   :  { %1270 = vmatpush3.bf16.msra.mxu1 %v1619_v32 }
 0x426   :  { %v954_v15 = vpop.f32.mrb[4].mxu1  ;;  %v1079_v16 = vpop.f32.mrb[8].mxu0 }
 0x427   :  { %v955_v31 = vpop.f32.mrb[5].mxu1  ;;  %v648_v4 = vpop.f32.mrb[9].mxu0 }
 0x428   :  { %v956_v19 = vadd.f32 %v955_v31, %v954_v15 }
 0x42a   :  { %v649_v17 = vadd.f32 %v956_v19, %v648_v4  ;;  %v957_v18 = vpop.f32.mrb[6].mxu1  ;;  %v1082_v22 = vpop.f32.mrb[10].mxu0 }
 0x42b   :  { %v958_v20 = vpop.f32.mrb[7].mxu1  ;;  %v658_v23 = vpop.f32.mrb[11].mxu0 }
 0x42c   :  { %v959_v21 = vadd.f32 %v958_v20, %v957_v18  ;;  %v676_v32 = vmul.f32 %v649_v17, %v649_v17 }
 0x42e   :  { %v654_v25 = vadd.f32 %v1079_v16, %v959_v21  ;;  %v960_v24 = vpop.f32.mrb[8].mxu1 }
 0x42f   :  { %v961_v26 = vpop.f32.mrb[9].mxu1 }
 0x430   :  { %v962_v27 = vadd.f32 %v961_v26, %v960_v24  ;;  %v677_v28 = vmul.f32 %v654_v25, %v654_v25  ;;  %v667_v36 = vadd.f32 %v654_v25, %v649_v17 }
 0x432   :  { %v659_v29 = vadd.f32 %v962_v27, %v658_v23  ;;  %v963_v0 = vpop.f32.mrb[10].mxu1  ;;  %v680_v40 = vadd.f32 %v677_v28, %v676_v32 }
 0x433   :  { %v964_v30 = vpop.f32.mrb[11].mxu1 }
 0x434   :  { %v678_v37 = vmul.f32 %v659_v29, %v659_v29  ;;  %v965_v39 = vadd.f32 %v964_v30, %v963_v0  ;;  %v668_v41 = vadd.f32 %v667_v36, %v659_v29 }
 0x436   :  { %v664_v43 = vadd.f32 %v1082_v22, %v965_v39  ;;  %v681_v44 = vadd.f32 %v680_v40, %v678_v37 }
 0x438   :  { %v669_v45 = vadd.f32 %v668_v41, %v664_v43  ;;  %v679_v46 = vmul.f32 %v664_v43, %v664_v43 }
 0x43a   :  { %v670_v48 = vrot.slane %v669_v45, 4  ;;  %v682_v49 = vadd.f32 %v681_v44, %v679_v46 }
 0x43c   :  { %v671_v50 = vadd.f32 %v670_v48, %v669_v45  ;;  %v683_v51 = vrot.slane %v682_v49, 4 }
 0x43e   :  { %v672_v52 = vrot.slane %v671_v50, 2  ;;  %v684_v53 = vadd.f32 %v683_v51, %v682_v49 }
 0x440   :  { %v673_v54 = vadd.f32 %v672_v52, %v671_v50  ;;  %v685_v58 = vrot.slane %v684_v53, 2 }
 0x442   :  { %v674_v59 = vrot.slane %v673_v54, 1  ;;  %v686_v60 = vadd.f32 %v685_v58, %v684_v53 }
 0x444   :  { %v687_v61 = vrot.slane %v686_v60, 1  ;;  %v675_v62 = vadd.f32 %v674_v59, %v673_v54 }
 0x446   :  { %v688_v63 = vadd.f32 %v687_v61, %v686_v60 }
 0x448   :  { %v689_v3 = vsel %vm246_vm4, %v675_v62, %v688_v63 }
 0x449   :  { %1116 = vmatmul.mubr.f32.vlgmr.msra.gmra.mrb[12].mxu1 %v689_v3 }
 0x51c   :  { %v756_v5 = vpop.f32.mrb[12].mxu1 }
 0x51d   :  { %v760_v6 = vmul.f32 %v756_v5, %v756_v5  ;;  %v1117_v9 = vpop.f32.mrb[13].mxu1 }
 0x51f   :  { %v762_v10 = vrot.slane %v760_v6, 7 }
 0x521   :  { %v764_v11 = vsub.f32 %v756_v5, %v762_v10 }
 0x523   :  { %v765_v12 = vadd.f32 1e-05, %v764_v11 }
 0x525   :  { %1281 = vrsqrt.f32 %v765_v12 }
 0x52f   :  { %v1282_v1 = vpop.eup %1281 }
 0x530   :  { %v768_v13 = vrot.slane %v1282_v1, 7 }
 0x532   :  { %v770_v14 = vmul.f32 %v768_v13, %v1656_v34 }
 0x534   :  { %v772_v33 = vrot.slane %v770_v14, 2 }
 0x536   :  { %v774_v2 = vmul.f32 %v772_v33, %v756_v5 }
 0x538   :  { %v776_v35 = vrot.slane %v774_v2, 5 }
 0x53a   :  { %v778_v42 = vsub.f32 %v1656_v34, %v776_v35 }
 0x53c   :  { %v780_v47 = vrot.slane %v778_v42, 2 }
 0x53e   :  { %v782_v7 = vsel %vm246_vm4, %v772_v33, %v780_v47 }
 0x53f   :  { %1121 = vmatmul.mubr.msk.f32.vlgmr.msra.gmra.mrb[12].mxu0 %vm335_vm5, %v782_v7 }
 0x612   :  { %v852_v8 = vpop.f32.mrb[12].mxu0 }
 0x613   :  { %v859_v38 = vrot.slane %v852_v8, %v411_v56  ;;  %v1122_v15 = vpop.f32.mrb[13].mxu0  ;;  %v867_v16 = vrot.slane %v852_v8, %v419_v57 }
 0x615   :  { %v860_v31 = vmul.f32 %v859_v38, %v649_v17  ;;  %v861_v19 = vmul.f32 %v859_v38, %v654_v25  ;;  %v862_v4 = vmul.f32 %v859_v38, %v659_v29  ;;  %v863_v18 = vmul.f32 %v859_v38, %v664_v43 }
 0x617   :  { %v868_v34 = vadd.f32 %v867_v16, %v860_v31  ;;  %v869_v22 = vadd.f32 %v867_v16, %v861_v19  ;;  %v870_v20 = vadd.f32 %v867_v16, %v862_v4  ;;  %v871_v21 = vadd.f32 %v867_v16, %v863_v18 }
 0x619   :  { %v872_v23 = vmax.f32 %v868_v34, 0.0  ;;  %v873_v24 = vmax.f32 %v869_v22, 0.0  ;;  %v874_v26 = vmax.f32 %v870_v20, 0.0  ;;  %v875_v27 = vmax.f32 %v871_v21, 0.0 }
 0x61b   :  { %876 = vst [vmem:[#allocation6] sm:$0xff] %v872_v23  ;;  %877 = vst [vmem:[#allocation6 + $0x8] sm:$0xff] %v873_v24 }
 0x61c   :  { %878 = vst [vmem:[#allocation6 + $0x10] sm:$0xff] %v874_v26  ;;  %879 = vst [vmem:[#allocation6 + $0x18] sm:$0xff] %v875_v27 }
 0x61d   :  { %1316 = shalt.err (!%p1313_p12)
}
 0x61e   :  { %s1317_s12 = scalar_lea.hbm %s1726_s6, 512 }
 0x61f   :  { %p1318_p13 = scmp.ne.s32.totalorder %s1726_s6, %s1317_s12  ;;  %p1321_p0 = scmp.lt.u32.totalorder %s1317_s12, %s1726_s6 }
 0x621   :  { %p1323_p1 = pnand %p1321_p0, %p1318_p13 }
 0x623   :  { %1326 = shalt.err (!%p1323_p1)
}
 0x624   :  { %891 = dma.vmem_to_hbm [thread:$0]  %s886_s0, 512, %s1726_s6, [#allocation5], %s1332_s7, %s1332_s7, %s1333_s8  }
 0x625   :  { %1329 = dma.done.wait [#allocation5], 512  }
 0x626   :  { %1330 = vsyncadd [#allocation5], 4294966784 }
 0x627   :  { %895 = vsyncpa [#allocation4], 1 }
 0x628   :  { %896 = vsyncpa [#allocation5], 1 }

</bundles_post_ra>
